<compile_context>
chip_gen: v6e
topology: v6e:2x2x1
jax: 0.10.0
libtpu: 0.0.40
codegen_flags: <defaults>
</compile_context>

<pallas_src>
import functools
import math

import jax
import jax.numpy as jnp
from jax.experimental import pallas as pl
from jax.experimental.pallas import tpu as pltpu


# ---------------------------------------------------------------------------
# VMEM budgeting / destination-row tile selection (generation aware).
# ---------------------------------------------------------------------------
def _vmem_limit_bytes():
    try:
        info = pltpu.get_tpu_info()
        phys = int(getattr(info, "vmem_capacity_bytes", 64 * 1024 * 1024))
    except Exception:  # non-TPU backend / older jax: be conservative
        phys = 64 * 1024 * 1024
    # Use at most half the physical VMEM (v7x: 32 MiB, v5e/v6e: 64 MiB).
    return int(min(max(phys // 2, 16 * 1024 * 1024), 64 * 1024 * 1024))


def _pick_dst_tile(n, hf, *, adj_bytes=2, max_tile=1024, budget_bytes=None):
    """Largest multiple-of-128 divisor of n (<= max_tile) whose double-buffered
    working set fits the VMEM budget; falls back to the full array (grid=1)."""
    if budget_bytes is None:
        budget_bytes = _vmem_limit_bytes() - (4 << 20)  # headroom for scratch
    # Resident across grid steps: feat_src (n*hf*4B), elT / pr_row (padded),
    # bias, plus slack.
    resident = n * hf * 4 + 2 * 8 * n * 4 + (1 << 14)
    tm = min(n, max_tile)
    tm -= tm % 128
    while tm >= 128:
        if n % tm == 0:
            per_step = 2 * (tm * n * adj_bytes      # adj tile (double buffered)
                            + tm * hf * 4           # out tile
                            + tm * 128 * 4)         # er tile (lane padded)
            if resident + per_step <= budget_bytes:
                return tm
        tm -= 128
    return n


# ---------------------------------------------------------------------------
# Kernel 1: projection.  feat_src = feat @ W, er = feat @ Wr, elT = (feat@Wl).T
# ---------------------------------------------------------------------------
def _qagat_proj_kernel(feat_ref, w_ref, wl_ref, wr_ref,
                       fs_ref, elT_ref, er_ref):
    feat = feat_ref[...]                                               # (TM, Din)
    # fc: feat_src for this row tile, one lane-dense store.
    fs_ref[...] = jnp.dot(feat, w_ref[...],
                          preferred_element_type=jnp.float32)          # (TM, HF)
    # er[v, h] = sum_f feat_src[v, h, f] * attn_r[h, f]   (attn_r folded in Wr)
    er_ref[...] = jnp.dot(feat, wr_ref[...],
                          preferred_element_type=jnp.float32)          # (TM, H)
    # elT[h, u] = sum_d Wl[d, h] * feat[u, d]  -- produced already transposed
    # so the attention kernel never needs feat.T.
    elT_ref[...] = jnp.einsum('dh,nd->hn', wl_ref[...], feat,
                              preferred_element_type=jnp.float32)      # (H, TM)


# ---------------------------------------------------------------------------
# Kernel 2: per destination-row tile attention + aggregation.
# ---------------------------------------------------------------------------
def _qagat_attn_kernel(adj_ref, pr_ref, elT_ref, er_ref, fs_ref, bias_ref,
                       out_ref, *, num_heads, negative_slope):
    # Loop-invariant N^2 work hoisted out of the per-head loop.
    mask = adj_ref[...] > 0                    # (TM, N) bool, adj is bf16
    pr_row = pr_ref[...]                       # (1, N)   pr_score of sources
    elT = elT_ref[...]                         # (H, N)
    er = er_ref[...]                           # (TM, H)
    neg_inf = jnp.float32(-1e30)

    outs = []
    for h in range(num_heads):
        # e[v, u] = leaky_relu(el[u] + er[v]) on edges, -inf elsewhere.
        logits = elT[h:h + 1, :] + er[:, h:h + 1]                      # (TM, N)
        logits = jnp.where(logits >= 0, logits, negative_slope * logits)
        logits = jnp.where(mask, logits, neg_inf)
        # edge_softmax + PR-score reweighting + renormalization collapse to:
        #   c = exp(e - m) * pr / sum_u(exp(e - m) * pr)
        # (off-edge entries underflow to exactly 0; rows are assumed to have
        #  at least one incoming edge, e.g. a self loop, same as the reference)
        m = jnp.max(logits, axis=1, keepdims=True)
        q = jnp.exp(logits - m) * pr_row                               # (TM, N)
        inv = pl.reciprocal(jnp.sum(q, axis=1, keepdims=True), approx=True)
        c = q * inv
        # aggregation: out[v, h, :] = sum_u c[v, u] * feat_src[u, h, :]
        outs.append(jnp.dot(c, fs_ref[h],
                            preferred_element_type=jnp.float32))       # (TM, F)
    # Single lane-dense store (plus bias) instead of H narrow F-wide stores.
    out_ref[...] = jnp.concatenate(outs, axis=-1) + bias_ref[...]


# ---------------------------------------------------------------------------
# Wrapper: parameter folding / layout glue + the two pallas_calls.
# ---------------------------------------------------------------------------
def qagat_forward(feat, W, attn_l, attn_r, bias, adj, pr_score,
                  negative_slope=0.2, max_dst_tile=1024):
    N, Din = feat.shape
    _, H, F = attn_l.shape
    HF = H * F

    feat = feat.astype(jnp.float32)
    W = W.astype(jnp.float32)
    # Fold attention vectors into tiny projections (pure parameter glue):
    #   el = feat @ Wl,  er = feat @ Wr
    W3 = W.reshape(Din, H, F)
    Wl = jnp.einsum('dhf,hf->dh', W3, attn_l[0].astype(jnp.float32))   # (Din, H)
    Wr = jnp.einsum('dhf,hf->dh', W3, attn_r[0].astype(jnp.float32))   # (Din, H)

    vmem_limit = _vmem_limit_bytes()
    tm = _pick_dst_tile(N, HF, max_tile=max_dst_tile,
                        budget_bytes=vmem_limit - (4 << 20))
    grid = (N // tm,)
    cparams = pltpu.CompilerParams(dimension_semantics=("parallel",),
                                   vmem_limit_bytes=vmem_limit)

    # --- kernel 1: projection (row-tiled, parallel) ------------------------
    fs, elT, er = pl.pallas_call(
        _qagat_proj_kernel,
        grid=grid,
        in_specs=[
            pl.BlockSpec((tm, Din), lambda i: (i, 0)),     # feat tile
            pl.BlockSpec((Din, HF), lambda i: (0, 0)),     # W
            pl.BlockSpec((Din, H), lambda i: (0, 0)),      # Wl
            pl.BlockSpec((Din, H), lambda i: (0, 0)),      # Wr
        ],
        out_specs=[
            pl.BlockSpec((tm, HF), lambda i: (i, 0)),      # feat_src
            pl.BlockSpec((H, tm), lambda i: (0, i)),       # elT
            pl.BlockSpec((tm, H), lambda i: (i, 0)),       # er
        ],
        out_shape=[
            jax.ShapeDtypeStruct((N, HF), jnp.float32),
            jax.ShapeDtypeStruct((H, N), jnp.float32),
            jax.ShapeDtypeStruct((N, H), jnp.float32),
        ],
        compiler_params=cparams,
    )(feat, W, Wl, Wr)

    # Layout plumbing only: per-head (N, F) slabs so the aggregation matmul
    # indexes feat_src with a zero-cost leading-axis ref slice.
    fs3 = fs.reshape(N, H, F).transpose(1, 0, 2)           # (H, N, F)

    adj_bf16 = adj.astype(jnp.bfloat16)                    # mask-only use
    pr_row = pr_score.reshape(1, N).astype(jnp.float32)
    bias2d = bias.reshape(1, HF).astype(jnp.float32)

    kernel = functools.partial(_qagat_attn_kernel, num_heads=H,
                               negative_slope=negative_slope)
    # --- kernel 2: attention + aggregation (dst-row-tiled, parallel) -------
    out = pl.pallas_call(
        kernel,
        grid=grid,
        in_specs=[
            pl.BlockSpec((tm, N), lambda i: (i, 0)),       # adj tile (bf16)
            pl.BlockSpec((1, N), lambda i: (0, 0)),        # pr_row
            pl.BlockSpec((H, N), lambda i: (0, 0)),        # elT (sources)
            pl.BlockSpec((tm, H), lambda i: (i, 0)),       # er (dst tile)
            pl.BlockSpec((H, N, F), lambda i: (0, 0, 0)),  # feat_src (resident)
            pl.BlockSpec((1, HF), lambda i: (0, 0)),       # bias
        ],
        out_specs=pl.BlockSpec((tm, HF), lambda i: (i, 0)),
        out_shape=jax.ShapeDtypeStruct((N, HF), jnp.float32),
        compiler_params=cparams,
    )(adj_bf16, pr_row, elT, er, fs3, bias2d)
    return out.reshape(N, H, F)


# ---------------------------------------------------------------------------
# Plain-JAX reference of the PyTorch/DGL forward (dense adjacency).
# ---------------------------------------------------------------------------
def qagat_reference(feat, W, attn_l, attn_r, bias, adj, pr_score,
                    negative_slope=0.2):
    N = feat.shape[0]
    _, H, F = attn_l.shape
    fs = (feat @ W).reshape(N, H, F)
    el = (fs * attn_l).sum(-1)                      # (N, H)
    er = (fs * attn_r).sum(-1)                      # (N, H)
    e = el[None, :, :] + er[:, None, :]             # (N_dst, N_src, H)
    e = jnp.where(e >= 0, e, negative_slope * e)
    mask = adj[:, :, None] > 0
    e = jnp.where(mask, e, -1e30)
    m = e.max(axis=1, keepdims=True)
    p = jnp.exp(e - m) * adj[:, :, None]
    a = p / p.sum(axis=1, keepdims=True)            # edge_softmax
    sum_pr = adj @ pr_score                         # (N,)
    b = adj * pr_score[None, :] / sum_pr[:, None]   # (N, N)
    c = a * b[:, :, None]
    c = c / c.sum(axis=1, keepdims=True)
    out = jnp.einsum('vuh,uhf->vhf', c, fs) + bias.reshape(1, H, F)
    return out


if __name__ == "__main__":
    N, IN_FEATS, OUT_FEATS, NUM_HEADS = 512, 32, 16, 4
    HF = NUM_HEADS * OUT_FEATS

    key = jax.random.PRNGKey(0)
    k_w, k_al, k_ar, k_feat, k_adj, k_pr = jax.random.split(key, 6)

    gain = math.sqrt(2.0)  # calculate_gain('relu')
    # fc.weight (xavier_normal), stored transposed as (Din, H*F)
    std_w = gain * math.sqrt(2.0 / (IN_FEATS + HF))
    W = std_w * jax.random.normal(k_w, (IN_FEATS, HF), dtype=jnp.float32)
    # attn_l / attn_r, shape (1, H, F) (xavier_normal on that tensor)
    std_a = gain * math.sqrt(2.0 / (NUM_HEADS * OUT_FEATS + OUT_FEATS))
    attn_l = std_a * jax.random.normal(k_al, (1, NUM_HEADS, OUT_FEATS), dtype=jnp.float32)
    attn_r = std_a * jax.random.normal(k_ar, (1, NUM_HEADS, OUT_FEATS), dtype=jnp.float32)
    bias = jnp.zeros((HF,), dtype=jnp.float32)      # constant_(bias, 0)

    # Inputs: node features, dense adjacency (with self loops), pr_score > 0.
    feat = jax.random.normal(k_feat, (N, IN_FEATS), dtype=jnp.float32)
    rand = jax.random.uniform(k_adj, (N, N))
    adj = jnp.where((rand < 0.05) | (jnp.eye(N) > 0), 1.0, 0.0).astype(jnp.float32)
    pr_score = jax.random.uniform(k_pr, (N,), dtype=jnp.float32) + 0.1

    # max_dst_tile=256: exercises the multi-step double-buffered pipeline even
    # at this small N (and matches the v7x VMEM guidance for large N).
    out = qagat_forward(feat, W, attn_l, attn_r, bias, adj, pr_score,
                        max_dst_tile=256)
    out = jax.block_until_ready(out)

    ref = qagat_reference(feat, W, attn_l, attn_r, bias, adj, pr_score)
    assert out.shape == (N, NUM_HEADS, OUT_FEATS)
    assert jnp.allclose(out, ref, rtol=2e-2, atol=2e-2), (
        f"max abs diff {jnp.max(jnp.abs(out - ref))}")

    print("KERNEL_OK")
</pallas_src>

<mosaic_0001>
module attributes {stable_mosaic.version = 11 : i64} {
  func.func @_qagat_proj_kernel(%arg0: i32, %arg1: memref<256x32xf32, #tpu.memory_space<vmem>>, %arg2: memref<32x64xf32, #tpu.memory_space<vmem>>, %arg3: memref<32x4xf32, #tpu.memory_space<vmem>>, %arg4: memref<32x4xf32, #tpu.memory_space<vmem>>, %arg5: memref<256x64xf32, #tpu.memory_space<vmem>>, %arg6: memref<4x256xf32, #tpu.memory_space<vmem>>, %arg7: memref<256x4xf32, #tpu.memory_space<vmem>>) attributes {dimension_semantics = [#tpu.dimension_semantics<parallel>], iteration_bounds = array<i64: 2>, scalar_prefetch = 0 : i64, scratch_operands = 0 : i64, tpu.core_type = #tpu.core_type<tc>, window_params = [{transform_indices = @transform_0, window_bounds = array<i64: 256, 32>}, {pipeline_mode = #tpu.pipeline_mode<synchronous>, transform_indices = @transform_1, window_bounds = array<i64: 32, 64>}, {pipeline_mode = #tpu.pipeline_mode<synchronous>, transform_indices = @transform_2, window_bounds = array<i64: 32, 4>}, {pipeline_mode = #tpu.pipeline_mode<synchronous>, transform_indices = @transform_3, window_bounds = array<i64: 32, 4>}, {transform_indices = @transform_4, window_bounds = array<i64: 256, 64>}, {transform_indices = @transform_5, window_bounds = array<i64: 4, 256>}, {transform_indices = @transform_6, window_bounds = array<i64: 256, 4>}]} {
    %c0 = arith.constant 0 : index
    %c0_0 = arith.constant 0 : index
    %0 = vector.load %arg1[%c0, %c0_0] : memref<256x32xf32, #tpu.memory_space<vmem>>, vector<256x32xf32>
    %c0_1 = arith.constant 0 : index
    %c0_2 = arith.constant 0 : index
    %1 = vector.load %arg2[%c0_1, %c0_2] : memref<32x64xf32, #tpu.memory_space<vmem>>, vector<32x64xf32>
    %cst = arith.constant dense<0.000000e+00> : vector<256x64xf32>
    %2 = tpu.matmul %0, %1, %cst {dimension_numbers = #tpu.dot_dimension_numbers<[1], [0], [0], [1], [0, 0, 1, 1], [], []>} : vector<256x32xf32>, vector<32x64xf32>, vector<256x64xf32> -> vector<256x64xf32>
    %c0_3 = arith.constant 0 : index
    %c0_4 = arith.constant 0 : index
    %3 = vector.load %arg5[%c0_3, %c0_4] : memref<256x64xf32, #tpu.memory_space<vmem>>, vector<256x64xf32>
    tpu.vector_store %arg5[%c0_3, %c0_4], %2 {strides = array<i32>} : memref<256x64xf32, #tpu.memory_space<vmem>>, vector<256x64xf32>,
    %c0_5 = arith.constant 0 : index
    %c0_6 = arith.constant 0 : index
    %4 = vector.load %arg4[%c0_5, %c0_6] : memref<32x4xf32, #tpu.memory_space<vmem>>, vector<32x4xf32>
    %cst_7 = arith.constant dense<0.000000e+00> : vector<256x4xf32>
    %5 = tpu.matmul %0, %4, %cst_7 {dimension_numbers = #tpu.dot_dimension_numbers<[1], [0], [0], [1], [0, 0, 1, 1], [], []>} : vector<256x32xf32>, vector<32x4xf32>, vector<256x4xf32> -> vector<256x4xf32>
    %c0_8 = arith.constant 0 : index
    %c0_9 = arith.constant 0 : index
    %6 = vector.load %arg7[%c0_8, %c0_9] : memref<256x4xf32, #tpu.memory_space<vmem>>, vector<256x4xf32>
    tpu.vector_store %arg7[%c0_8, %c0_9], %5 {strides = array<i32>} : memref<256x4xf32, #tpu.memory_space<vmem>>, vector<256x4xf32>,
    %c0_10 = arith.constant 0 : index
    %c0_11 = arith.constant 0 : index
    %7 = vector.load %arg3[%c0_10, %c0_11] : memref<32x4xf32, #tpu.memory_space<vmem>>, vector<32x4xf32>
    "tpu.trace_start"() <{level = 10 : i32, message = "dh,nd->hn"}> : () -> ()
    %cst_12 = arith.constant dense<0.000000e+00> : vector<4x256xf32>
    %8 = tpu.matmul %7, %0, %cst_12 {dimension_numbers = #tpu.dot_dimension_numbers<[0], [1], [1], [0], [0, 1, 1, 0], [], []>} : vector<32x4xf32>, vector<256x32xf32>, vector<4x256xf32> -> vector<4x256xf32>
    "tpu.trace_stop"() : () -> ()
    %c0_13 = arith.constant 0 : index
    %c0_14 = arith.constant 0 : index
    %9 = vector.load %arg6[%c0_13, %c0_14] : memref<4x256xf32, #tpu.memory_space<vmem>>, vector<4x256xf32>
    tpu.vector_store %arg6[%c0_13, %c0_14], %8 {strides = array<i32>} : memref<4x256xf32, #tpu.memory_space<vmem>>, vector<4x256xf32>,
    return
  }
  func.func @transform_0(%arg0: i32) -> (i32, i32) {
    %c0_i32 = arith.constant 0 : i32
    %c0_i32_0 = arith.constant 0 : i32
    return %arg0, %c0_i32 : i32, i32
  }
  func.func @transform_1(%arg0: i32) -> (i32, i32) {
    %c0_i32 = arith.constant 0 : i32
    %c0_i32_0 = arith.constant 0 : i32
    %c0_i32_1 = arith.constant 0 : i32
    return %c0_i32, %c0_i32_0 : i32, i32
  }
  func.func @transform_2(%arg0: i32) -> (i32, i32) {
    %c0_i32 = arith.constant 0 : i32
    %c0_i32_0 = arith.constant 0 : i32
    %c0_i32_1 = arith.constant 0 : i32
    return %c0_i32, %c0_i32_0 : i32, i32
  }
  func.func @transform_3(%arg0: i32) -> (i32, i32) {
    %c0_i32 = arith.constant 0 : i32
    %c0_i32_0 = arith.constant 0 : i32
    %c0_i32_1 = arith.constant 0 : i32
    return %c0_i32, %c0_i32_0 : i32, i32
  }
  func.func @transform_4(%arg0: i32) -> (i32, i32) {
    %c0_i32 = arith.constant 0 : i32
    %c0_i32_0 = arith.constant 0 : i32
    return %arg0, %c0_i32 : i32, i32
  }
  func.func @transform_5(%arg0: i32) -> (i32, i32) {
    %c0_i32 = arith.constant 0 : i32
    %c0_i32_0 = arith.constant 0 : i32
    return %c0_i32, %arg0 : i32, i32
  }
  func.func @transform_6(%arg0: i32) -> (i32, i32) {
    %c0_i32 = arith.constant 0 : i32
    %c0_i32_0 = arith.constant 0 : i32
    return %arg0, %c0_i32 : i32, i32
  }
}

</mosaic_0001>

<bundles_post_ra>
// kernel: tpu_custom_call.1
= control target key start
LH: loop header
LB: loop body
LE: loop exit
PB: predicated region body
PF: predicated region fallthrough
CT: control target
= control target key end

     0   :  { %12 = vsyncpa [#allocation3], 0  ;;  %s2132_s0 = inlined_call_operand.vmem [shape: f32[512,32], index: 0, kind: input, shape index: {}]   ;;  %s2133_s1 = inlined_call_operand.vmem [shape: f32[32,64], index: 1, kind: input, shape index: {}]   ;;  %s2134_s2 = inlined_call_operand.vmem [shape: f32[32,4], index: 2, kind: input, shape index: {}]   ;;  %s2135_s3 = inlined_call_operand.vmem [shape: f32[32,4], index: 3, kind: input, shape index: {}]   ;;  %s2136_s4 = inlined_call_operand.vmem [shape: f32[512,64], index: 4, kind: output, shape index: {0}]   ;;  %s2137_s5 = inlined_call_operand.hbm [shape: f32[4,512], index: 5, kind: output, shape index: {1}]   ;;  %s2138_s6 = inlined_call_operand.vmem [shape: f32[512,4], index: 6, kind: output, shape index: {2}]  }
   0x1   :  { %14 = vsyncpa [#allocation3 + $0x1], 0  ;;  %s1660_s21 = smov 0   ;;  %s1662_s22 = smov 0  }
   0x2   :  { %s1664_s23 = smov 0   ;;  %s1666_s24 = smov 0  }
   0x3 LB: > { %s1681_s25 = sadd.s32 4294967295, %s1622_s24   ;;  %s1190_s26 = sadd.s32 4294967294, %s1622_s24   ;;  %s1622_s24 = sphi %s1666_s24, %s2144_s24   ;;  %s1618_s23 = sphi %s1664_s23, %s2143_s23   ;;  %s1614_s22 = sphi %s1662_s22, %s2142_s22   ;;  %s1610_s21 = sphi %s1660_s21, %s2141_s21  }
   0x4   : > { %s1685_s27 = sadd.s32 1, %s1622_s24   ;;  %s142_s28 = sadd.s32 1, %s1618_s23 }
   0x5   : > { %s139_s29 = ssub.s32 %s1622_s24, %s1685_s27  ;;  %p152_p0 = scmp.ne.s32.totalorder %s1618_s23, %s1614_s22 }
   0x6   : > { %p140_p1 = scmp.eq.s32.totalorder %s139_s29, 0  ;;  %p153_p2 = scmp.eq.s32.totalorder %s1681_s25, 1 }
   0x7   : > { %p158_p3 = scmp.ne.s32.totalorder %s1614_s22, %s1610_s21  ;;  %p159_p4 = scmp.eq.s32.totalorder %s1190_s26, 1 }
   0x8   : > { %s1696_s30 = scalar_select %p140_p1, %s1618_s23, %s142_s28  }
   0x9   : > { %p1698_p5 = por %p153_p2, %p152_p0  ;;  %p1702_p6 = por %p159_p4, %p158_p3 }
   0xa   : > { %p1193_p7 = scmp.ge.s32.totalorder %s1622_s24, 1  ;;  %p221_p8 = scmp.lt.s32.totalorder %s1622_s24, 3 }
   0xc   : > { %p222_p9 = pnand %p1193_p7, %p221_p8 }
   0xd   : > { %s1195_s11 = sshll.u32 (!%p222_p9), %s1681_s25, 5  ;;  %s1624_s9 = smov (!%p222_p9), [#allocation2]  }
   0xe   : > { %225 = sbr.rel (%p222_p9) target bundleno = 356 (0x164), region = 36  ;;  %p262_p10 = scmp.lt.s32.totalorder (!%p222_p9), %s1195_s11, 63 }
  0x13   : > { %v933_v0 = vld [vmem:[%s2134_s2] sm:$0xff]  ;;  %v315_v1 = vld [vmem:[%s2133_s1 + $0x18] sm:$0xff]  ;;  %v314_v2 = vld [vmem:[%s2133_s1 + $0x10] sm:$0xff]  ;;  %s2146_s11 = smov (!%p262_p10, %s1195_s11), 63  ;;  %vm316_vm0 = vcmask 261120   ;;  %vm638_vm1 = vcmask 523264  }
  0x14   : > { %937 = vxpose.xlu0.b32.start [1/4] (short) (narrow) %v933_v0, 8  ;;  %v934_v3 = vld [vmem:[%s2134_s2 + $0x8] sm:$0xff]  ;;  %1410 = vmatprep.subr.mxu0 %v315_v1  ;;  %v674_v4 = vld [vmem:[%s2135_s3 + $0x18] sm:$0xff]  ;;  %v673_v6 = vld [vmem:[%s2135_s3 + $0x10] sm:$0xff]  ;;  %s1733_s12 = sshll.u32 %s2146_s11, 3  ;;  %vm900_vm2 = vcmask 31744  }
  0x15   : > { %1411 = vmatpush3.msra.mxu0 %v315_v1  ;;  %v313_v5 = vld [vmem:[%s2133_s1 + $0x8] sm:$0xff]  ;;  %1466 = vmatprep.subr.mxu1 %v674_v4  ;;  %v312_v7 = vld [vmem:[%s2133_s1] sm:$0xff]  ;;  %v935_v8 = vld [vmem:[%s2134_s2 + $0x10] sm:$0xff]  ;;  %s1742_s17 = scalar_lea.vmem %s2132_s0, %s1733_s12  ;;  %s1962_s10 = scalar_lea.vmem %s2136_s4, %s1733_s12 }
  0x16   : > { %1412 = vmatprep.subr.mxu0 %v314_v2  ;;  %1467 = vmatpush3.msra.mxu1 %v674_v4  ;;  %v1745_v9 = vld [vmem:[%s1742_s17] sm:$0xff]  ;;  %v1748_v10 = vld [vmem:[%s1742_s17 + $0x8] sm:$0xff]  ;;  %v1751_v11 = vld [vmem:[%s1742_s17 + $0xf8] sm:$0xff]  ;;  %s1974_s15 = scalar_lea.vmem %s2138_s6, %s1733_s12  ;;  %s251_s12 = sand.u32 1, %s1614_s22  }
  0x17   : > { %1413 = vmatpush3.msra.mxu0 %v314_v2  ;;  %1468 = vmatprep.subr.mxu1 %v673_v6  ;;  %v1756_v12 = vld [vmem:[%s1742_s17 + $0x78] sm:$0xff]  ;;  %v1759_v13 = vld [vmem:[%s1742_s17 + $0x10] sm:$0xff]  ;;  %v672_v14 = vld [vmem:[%s2135_s3 + $0x8] sm:$0xff]  ;;  %s1194_s16 = sshll.u32 %s251_s12, 3  ;;  %s1054_s28 = scalar_lea.sflag [#allocation3], %s251_s12 }
  0x18   : > { %938 = vxpose.xlu0.b32.cont [2/4] (short) (narrow) %v934_v3, 8  ;;  %1414 = vmatprep.subr.mxu0 %v313_v5  ;;  %v1765_v15 = vld [vmem:[%s1742_s17 + $0xf0] sm:$0xff]  ;;  %v936_v16 = vld [vmem:[%s2134_s2 + $0x18] sm:$0xff]  ;;  %v671_v18 = vld [vmem:[%s2135_s3] sm:$0xff]  ;;  %s253_s11 = scalar_lea.vmem [#allocation2], %s1194_s16 }
  0x19   : > { %1415 = vmatpush3.msra.mxu0 %v313_v5  ;;  %1469 = vmatpush3.msra.mxu1 %v673_v6  ;;  %v1779_v17 = vld [vmem:[%s1742_s17 + $0x18] sm:$0xff]  ;;  %v1787_v19 = vld [vmem:[%s1742_s17 + $0x70] sm:$0xff]  ;;  %v1790_v20 = vld [vmem:[%s1742_s17 + $0x20] sm:$0xff]  ;;  %s1077_s18 = sshll.u32 %s253_s11, 4  ;;  %s1078_s18 = int_to_ptr.vmem [resolvable:$true] %s1077_s18 }
  0x1a   : > { %1416 = vmatprep.subr.mxu0 %v312_v7  ;;  %1418 = vmatprep.mubr.msk.f32.mxu0 %vm316_vm0, %v1745_v9  ;;  %v1795_v21 = vld [vmem:[%s1742_s17 + $0xe8] sm:$0xff]  ;;  %v1807_v23 = vld [vmem:[%s1742_s17 + $0x30] sm:$0xff]  ;;  %v1819_v25 = vld [vmem:[%s1742_s17 + $0xe0] sm:$0xff]  ;;  %s1562_s29 = scalar_lea.vmem %s1078_s18, 128 }
  0x1b   : > { %1417 = vmatpush3.msra.mxu0 %v312_v7  ;;  %1470 = vmatprep.subr.mxu1 %v672_v14  ;;  %v1800_v22 = vld [vmem:[%s1742_s17 + $0x28] sm:$0xff]  ;;  %v287_v26 = vld [vmem:[%s1742_s17 + $0x38] sm:$0xff]  ;;  %v288_v27 = vld [vmem:[%s1742_s17 + $0x40] sm:$0xff]  ;;  %p1563_p11 = scmp.ne.s32.totalorder %s1078_s18, %s1562_s29 }
  0x1c   : > { %939 = vxpose.xlu0.b32.cont [3/4] (short) (narrow) %v935_v8, 8  ;;  %1419 = vmatmul.mubr.msk.f32.vlgmr.msra.gmra.mxu0 %vm316_vm0, %v1748_v10  ;;  %v293_v24 = vld [vmem:[%s1742_s17 + $0x68] sm:$0xff]  ;;  %v292_v28 = vld [vmem:[%s1742_s17 + $0x60] sm:$0xff]  ;;  %v1835_v29 = vld [vmem:[%s1742_s17 + $0xd8] sm:$0xff] }
  0x1d   : > { %1376 = vmatprep.subr.msk.mxu0 %vm316_vm0, %v1751_v11  ;;  %1421 = vmatprep.mubr.msk.f32.mxu0 %vm316_vm0, %v1759_v13  ;;  %v289_v30 = vld [vmem:[%s1742_s17 + $0x48] sm:$0xff]  ;;  %v290_v31 = vld [vmem:[%s1742_s17 + $0x50] sm:$0xff]  ;;  %v291_v32 = vld [vmem:[%s1742_s17 + $0x58] sm:$0xff]  ;;  %p1564_p12 = pnand %p1563_p11, %p1698_p5 }
  0x1e   : > { %1377 = vmatpush3.xpose.msk.msra.mxu0 %vm316_vm0, %v1756_v12  ;;  %1471 = vmatpush3.msra.mxu1 %v672_v14  ;;  %v1850_v33 = vld [vmem:[%s1742_s17 + $0xd0] sm:$0xff]  ;;  %v305_v34 = vld [vmem:[%s1742_s17 + $0xc8] sm:$0xff]  ;;  %v304_v35 = vld [vmem:[%s1742_s17 + $0xc0] sm:$0xff] }
  0x1f   : > { %1378 = vmatprep.subr.msk.mxu0 %vm316_vm0, %v1765_v15  ;;  %1472 = vmatprep.subr.mxu1 %v671_v18  ;;  %v296_v36 = vld [vmem:[%s1742_s17 + $0x80] sm:$0xff]  ;;  %v303_v37 = vld [vmem:[%s1742_s17 + $0xb8] sm:$0xff]  ;;  %v297_v38 = vld [vmem:[%s1742_s17 + $0x88] sm:$0xff]  ;;  %p1565_p13 = pneg %p1564_p12 }
  0x20   : > { %940 = vxpose.xlu0.b32.end [4/4] (short) (narrow) %v936_v16, 8  ;;  %1422 = vmatmul.mubr.msk.f32.gmra.mxu0 %vm316_vm0, %v1779_v17  ;;  %v298_v39 = vld [vmem:[%s1742_s17 + $0x90] sm:$0xff]  ;;  %v299_v41 = vld [vmem:[%s1742_s17 + $0x98] sm:$0xff]  ;;  %v300_v42 = vld [vmem:[%s1742_s17 + $0xa0] sm:$0xff] }
  0x21   : > { %1473 = vmatpush3.msra.mxu1 %v671_v18  ;;  %1474 = vmatprep.mubr.msk.f32.mxu1 %vm316_vm0, %v1745_v9  ;;  %v302_v40 = vld [vmem:[%s1742_s17 + $0xb0] sm:$0xff]  ;;  %v301_v43 = vld [vmem:[%s1742_s17 + $0xa8] sm:$0xff]  ;;  %s1303_s17 = sshll.u32 %s1681_s25, 7 }
  0x22   : > { %1379 = vmatpush3.xpose.msk.msra.mxu0 %vm316_vm0, %v1787_v19  ;;  %1424 = vmatprep.mubr.msk.f32.mxu0 %vm316_vm0, %v1790_v20  ;;  %s1075_s26 = scalar_lea.hbm %s2137_s5, %s1303_s17 }
  0x23   : > { %1475 = vmatmul.mubr.msk.f32.vlgmr.msra.gmra.mxu1 %vm316_vm0, %v1748_v10  ;;  %1380 = vmatprep.subr.msk.mxu0 %vm316_vm0, %v1795_v21 }
  0x24   : > { %1425 = vmatmul.mubr.msk.f32.gmra.mxu0 %vm316_vm0, %v1800_v22  ;;  %1477 = vmatprep.mubr.msk.f32.mxu1 %vm316_vm0, %v1759_v13 }
  0x25   : > { %1427 = vmatprep.mubr.msk.f32.mxu0 %vm316_vm0, %v1807_v23 }
  0x26   : > { %1381 = vmatpush3.xpose.msk.msra.mxu0 %vm316_vm0, %v293_v24 }
  0x27   : > { %1478 = vmatmul.mubr.msk.f32.gmra.mxu1 %vm316_vm0, %v1779_v17  ;;  %1382 = vmatprep.subr.msk.mxu0 %vm316_vm0, %v1819_v25 }
  0x28   : > { %1428 = vmatmul.mubr.msk.f32.gmra.mxu0 %vm316_vm0, %v287_v26  ;;  %1480 = vmatprep.mubr.msk.f32.mxu1 %vm316_vm0, %v1790_v20 }
  0x29   : > { %1430 = vmatprep.mubr.msk.f32.mxu0 %vm316_vm0, %v288_v27 }
  0x2a   : > { %1383 = vmatpush3.xpose.msk.msra.mxu0 %vm316_vm0, %v292_v28 }
  0x2b   : > { %1481 = vmatmul.mubr.msk.f32.gmra.mxu1 %vm316_vm0, %v1800_v22  ;;  %1384 = vmatprep.subr.msk.mxu0 %vm316_vm0, %v1835_v29 }
  0x2c   : > { %1431 = vmatmul.mubr.msk.f32.gmra.mxu0 %vm316_vm0, %v289_v30  ;;  %1483 = vmatprep.mubr.msk.f32.mxu1 %vm316_vm0, %v1807_v23 }
  0x2d   : > { %1433 = vmatprep.mubr.msk.f32.mxu0 %vm316_vm0, %v290_v31 }
  0x2e   : > { %1385 = vmatpush3.xpose.msk.msra.mxu0 %vm316_vm0, %v291_v32 }
  0x2f   : > { %1484 = vmatmul.mubr.msk.f32.gmra.mxu1 %vm316_vm0, %v287_v26  ;;  %1386 = vmatprep.subr.msk.mxu0 %vm316_vm0, %v1850_v33 }
  0x30   : > { %1434 = vmatmul.mubr.msk.f32.gmra.mxu0 %vm316_vm0, %v291_v32  ;;  %1486 = vmatprep.mubr.msk.f32.mxu1 %vm316_vm0, %v288_v27 }
  0x31   : > { %1436 = vmatprep.mubr.msk.f32.mxu0 %vm316_vm0, %v292_v28 }
  0x32   : > { %1387 = vmatpush3.xpose.msk.msra.mxu0 %vm316_vm0, %v290_v31 }
  0x33   : > { %1487 = vmatmul.mubr.msk.f32.gmra.mxu1 %vm316_vm0, %v289_v30  ;;  %1388 = vmatprep.subr.msk.mxu0 %vm316_vm0, %v305_v34 }
  0x34   : > { %1437 = vmatmul.mubr.msk.f32.gmra.mxu0 %vm316_vm0, %v293_v24  ;;  %1489 = vmatprep.mubr.msk.f32.mxu1 %vm316_vm0, %v290_v31 }
  0x35   : > { %1439 = vmatprep.mubr.msk.f32.mxu0 %vm316_vm0, %v1787_v19 }
  0x36   : > { %1389 = vmatpush3.xpose.msk.msra.mxu0 %vm316_vm0, %v289_v30 }
  0x37   : > { %1490 = vmatmul.mubr.msk.f32.gmra.mxu1 %vm316_vm0, %v291_v32  ;;  %1390 = vmatprep.subr.msk.mxu0 %vm316_vm0, %v304_v35 }
  0x38   : > { %1440 = vmatmul.mubr.msk.f32.gmra.mxu0 %vm316_vm0, %v1756_v12  ;;  %1492 = vmatprep.mubr.msk.f32.mxu1 %vm316_vm0, %v292_v28 }
  0x39   : > { %1442 = vmatprep.mubr.msk.f32.mxu0 %vm316_vm0, %v296_v36 }
  0x3a   : > { %1391 = vmatpush3.xpose.msk.msra.mxu0 %vm316_vm0, %v288_v27 }
  0x3b   : > { %1493 = vmatmul.mubr.msk.f32.gmra.mxu1 %vm316_vm0, %v293_v24  ;;  %1392 = vmatprep.subr.msk.mxu0 %vm316_vm0, %v303_v37 }
  0x3c   : > { %1443 = vmatmul.mubr.msk.f32.gmra.mxu0 %vm316_vm0, %v297_v38  ;;  %1495 = vmatprep.mubr.msk.f32.mxu1 %vm316_vm0, %v1787_v19 }
  0x3d   : > { %1445 = vmatprep.mubr.msk.f32.mxu0 %vm316_vm0, %v298_v39 }
  0x3e   : > { %1393 = vmatpush3.xpose.msk.msra.mxu0 %vm316_vm0, %v287_v26 }
  0x3f   : > { %1496 = vmatmul.mubr.msk.f32.gmra.mxu1 %vm316_vm0, %v1756_v12  ;;  %1394 = vmatprep.subr.msk.mxu0 %vm316_vm0, %v302_v40 }
  0x40   : > { %1446 = vmatmul.mubr.msk.f32.gmra.mxu0 %vm316_vm0, %v299_v41  ;;  %1498 = vmatprep.mubr.msk.f32.mxu1 %vm316_vm0, %v296_v36 }
  0x41   : > { %1448 = vmatprep.mubr.msk.f32.mxu0 %vm316_vm0, %v300_v42 }
  0x42   : > { %1395 = vmatpush3.xpose.msk.msra.mxu0 %vm316_vm0, %v1807_v23 }
  0x43   : > { %1499 = vmatmul.mubr.msk.f32.gmra.mxu1 %vm316_vm0, %v297_v38  ;;  %1396 = vmatprep.subr.msk.mxu0 %vm316_vm0, %v301_v43 }
  0x44   : > { %1449 = vmatmul.mubr.msk.f32.gmra.mxu0 %vm316_vm0, %v301_v43  ;;  %1501 = vmatprep.mubr.msk.f32.mxu1 %vm316_vm0, %v298_v39 }
  0x45   : > { %1451 = vmatprep.mubr.msk.f32.mxu0 %vm316_vm0, %v302_v40 }
  0x46   : > { %1397 = vmatpush3.xpose.msk.msra.mxu0 %vm316_vm0, %v1800_v22 }
  0x47   : > { %1502 = vmatmul.mubr.msk.f32.gmra.mxu1 %vm316_vm0, %v299_v41  ;;  %1398 = vmatprep.subr.msk.mxu0 %vm316_vm0, %v300_v42 }
  0x48   : > { %1452 = vmatmul.mubr.msk.f32.gmra.mxu0 %vm316_vm0, %v303_v37  ;;  %1504 = vmatprep.mubr.msk.f32.mxu1 %vm316_vm0, %v300_v42 }
  0x49   : > { %1454 = vmatprep.mubr.msk.f32.mxu0 %vm316_vm0, %v304_v35 }
  0x4a   : > { %1399 = vmatpush3.xpose.msk.msra.mxu0 %vm316_vm0, %v1790_v20 }
  0x4b   : > { %1505 = vmatmul.mubr.msk.f32.gmra.mxu1 %vm316_vm0, %v301_v43  ;;  %1400 = vmatprep.subr.msk.mxu0 %vm316_vm0, %v299_v41 }
  0x4c   : > { %1455 = vmatmul.mubr.msk.f32.gmra.mxu0 %vm316_vm0, %v305_v34  ;;  %1507 = vmatprep.mubr.msk.f32.mxu1 %vm316_vm0, %v302_v40 }
  0x4d   : > { %1457 = vmatprep.mubr.msk.f32.mxu0 %vm316_vm0, %v1850_v33 }
  0x4e   : > { %1401 = vmatpush3.xpose.msk.msra.mxu0 %vm316_vm0, %v1779_v17 }
  0x4f   : > { %1508 = vmatmul.mubr.msk.f32.gmra.mxu1 %vm316_vm0, %v303_v37  ;;  %1402 = vmatprep.subr.msk.mxu0 %vm316_vm0, %v298_v39 }
  0x50   : > { %1458 = vmatmul.mubr.msk.f32.gmra.mxu0 %vm316_vm0, %v1835_v29  ;;  %1510 = vmatprep.mubr.msk.f32.mxu1 %vm316_vm0, %v304_v35 }
  0x51   : > { %1460 = vmatprep.mubr.msk.f32.mxu0 %vm316_vm0, %v1819_v25 }
  0x52   : > { %1403 = vmatpush3.xpose.msk.msra.mxu0 %vm316_vm0, %v1759_v13 }
  0x53   : > { %1511 = vmatmul.mubr.msk.f32.gmra.mxu1 %vm316_vm0, %v305_v34  ;;  %1404 = vmatprep.subr.msk.mxu0 %vm316_vm0, %v297_v38 }
  0x54   : > { %1461 = vmatmul.mubr.msk.f32.gmra.mxu0 %vm316_vm0, %v1795_v21  ;;  %1513 = vmatprep.mubr.msk.f32.mxu1 %vm316_vm0, %v1850_v33 }
  0x55   : > { %1463 = vmatprep.mubr.msk.f32.mxu0 %vm316_vm0, %v1765_v15 }
  0x56   : > { %1405 = vmatpush3.xpose.msk.msra.mxu0 %vm316_vm0, %v1748_v10 }
  0x57   : > { %1514 = vmatmul.mubr.msk.f32.gmra.mxu1 %vm316_vm0, %v1835_v29  ;;  %1406 = vmatprep.subr.msk.mxu0 %vm316_vm0, %v296_v36 }
  0x58   : > { %1464 = vmatmul.mubr.msk.f32.gmra.mxu0 %vm316_vm0, %v1751_v11  ;;  %1516 = vmatprep.mubr.msk.f32.mxu1 %vm316_vm0, %v1819_v25 }
  0x5a   : > { %1407 = vmatpush3.xpose.msk.msra.mxu0 %vm316_vm0, %v1745_v9 }
  0x5b   : > { %1517 = vmatmul.mubr.msk.f32.gmra.mxu1 %vm316_vm0, %v1795_v21 }
  0x5c   : > { %1519 = vmatprep.mubr.msk.f32.mxu1 %vm316_vm0, %v1765_v15 }
  0x5f   : > { %1520 = vmatmul.mubr.msk.f32.gmra.mxu1 %vm316_vm0, %v1751_v11 }
  0x90   : > { %v953_v44 = vpop.trf.xlu0 }
  0x91   : > { %1408 = vmatprep.mubr.msk.f32.mxu0 %vm316_vm0, %v953_v44 }
  0x92   : > { %1409 = vmatmul.mubr.msk.f32.vlgmr.msra.gmra.mxu0 %vm316_vm0, %v953_v44 }
  0xdc   : > { %v1420_v45 = vpop.f32.mrf.mxu0 }
  0xdd   : > { %640 = vst.msk [vmem:[%s1962_s10 + $0x8] sm:$0xff] %vm638_vm1, %v1420_v45 }
  0xde   : > { %v479_v46 = vpop.f32.mrf.mxu0 }
  0xdf   : > { %639 = vst.msk [vmem:[%s1962_s10] sm:$0xff] %vm638_vm1, %v479_v46 }
  0xe0   : > { %v1423_v47 = vpop.f32.mrf.mxu0 }
  0xe1   : > { %642 = vst.msk [vmem:[%s1962_s10 + $0x18] sm:$0xff] %vm638_vm1, %v1423_v47 }
  0xe2   : > { %v489_v48 = vpop.f32.mrf.mxu0 }
  0xe3   : > { %641 = vst.msk [vmem:[%s1962_s10 + $0x10] sm:$0xff] %vm638_vm1, %v489_v48  ;;  %v1476_v49 = vpop.f32.mrf.mxu1 }
  0xe4   : > { %902 = vst.msk [vmem:[%s1974_s15 + $0x8] sm:$0xff] %vm900_vm2, %v1476_v49  ;;  %v1426_v50 = vpop.f32.mrf.mxu0 }
  0xe5   : > { %644 = vst.msk [vmem:[%s1962_s10 + $0x28] sm:$0xff] %vm638_vm1, %v1426_v50  ;;  %v741_v51 = vpop.f32.mrf.mxu1 }
  0xe6   : > { %901 = vst.msk [vmem:[%s1974_s15] sm:$0xff] %vm900_vm2, %v741_v51  ;;  %v499_v52 = vpop.f32.mrf.mxu0 }
  0xe7   : > { %643 = vst.msk [vmem:[%s1962_s10 + $0x20] sm:$0xff] %vm638_vm1, %v499_v52  ;;  %v1479_v53 = vpop.f32.mrf.mxu1 }
  0xe8   : > { %904 = vst.msk [vmem:[%s1974_s15 + $0x18] sm:$0xff] %vm900_vm2, %v1479_v53  ;;  %v1429_v54 = vpop.f32.mrf.mxu0 }
  0xe9   : > { %646 = vst.msk [vmem:[%s1962_s10 + $0x38] sm:$0xff] %vm638_vm1, %v1429_v54  ;;  %v751_v55 = vpop.f32.mrf.mxu1 }
  0xea   : > { %903 = vst.msk [vmem:[%s1974_s15 + $0x10] sm:$0xff] %vm900_vm2, %v751_v55  ;;  %v509_v56 = vpop.f32.mrf.mxu0 }
  0xeb   : > { %645 = vst.msk [vmem:[%s1962_s10 + $0x30] sm:$0xff] %vm638_vm1, %v509_v56  ;;  %v1482_v57 = vpop.f32.mrf.mxu1 }
  0xec   : > { %906 = vst.msk [vmem:[%s1974_s15 + $0x28] sm:$0xff] %vm900_vm2, %v1482_v57  ;;  %v1432_v58 = vpop.f32.mrf.mxu0 }
  0xed   : > { %648 = vst.msk [vmem:[%s1962_s10 + $0x48] sm:$0xff] %vm638_vm1, %v1432_v58  ;;  %v761_v59 = vpop.f32.mrf.mxu1 }
  0xee   : > { %905 = vst.msk [vmem:[%s1974_s15 + $0x20] sm:$0xff] %vm900_vm2, %v761_v59  ;;  %v519_v60 = vpop.f32.mrf.mxu0 }
  0xef   : > { %647 = vst.msk [vmem:[%s1962_s10 + $0x40] sm:$0xff] %vm638_vm1, %v519_v60  ;;  %v1485_v61 = vpop.f32.mrf.mxu1 }
  0xf0   : > { %908 = vst.msk [vmem:[%s1974_s15 + $0x38] sm:$0xff] %vm900_vm2, %v1485_v61  ;;  %v1435_v62 = vpop.f32.mrf.mxu0 }
  0xf1   : > { %650 = vst.msk [vmem:[%s1962_s10 + $0x58] sm:$0xff] %vm638_vm1, %v1435_v62  ;;  %v771_v63 = vpop.f32.mrf.mxu1 }
  0xf2   : > { %907 = vst.msk [vmem:[%s1974_s15 + $0x30] sm:$0xff] %vm900_vm2, %v771_v63  ;;  %v529_v0 = vpop.f32.mrf.mxu0 }
  0xf3   : > { %649 = vst.msk [vmem:[%s1962_s10 + $0x50] sm:$0xff] %vm638_vm1, %v529_v0  ;;  %v1488_v1 = vpop.f32.mrf.mxu1 }
  0xf4   : > { %910 = vst.msk [vmem:[%s1974_s15 + $0x48] sm:$0xff] %vm900_vm2, %v1488_v1  ;;  %v1438_v2 = vpop.f32.mrf.mxu0 }
  0xf5   : > { %652 = vst.msk [vmem:[%s1962_s10 + $0x68] sm:$0xff] %vm638_vm1, %v1438_v2  ;;  %v781_v3 = vpop.f32.mrf.mxu1 }
  0xf6   : > { %909 = vst.msk [vmem:[%s1974_s15 + $0x40] sm:$0xff] %vm900_vm2, %v781_v3  ;;  %v539_v4 = vpop.f32.mrf.mxu0 }
  0xf7   : > { %651 = vst.msk [vmem:[%s1962_s10 + $0x60] sm:$0xff] %vm638_vm1, %v539_v4  ;;  %v1491_v5 = vpop.f32.mrf.mxu1 }
  0xf8   : > { %912 = vst.msk [vmem:[%s1974_s15 + $0x58] sm:$0xff] %vm900_vm2, %v1491_v5  ;;  %v1441_v6 = vpop.f32.mrf.mxu0 }
  0xf9   : > { %654 = vst.msk [vmem:[%s1962_s10 + $0x78] sm:$0xff] %vm638_vm1, %v1441_v6  ;;  %v791_v7 = vpop.f32.mrf.mxu1 }
  0xfa   : > { %911 = vst.msk [vmem:[%s1974_s15 + $0x50] sm:$0xff] %vm900_vm2, %v791_v7  ;;  %v549_v8 = vpop.f32.mrf.mxu0 }
  0xfb   : > { %653 = vst.msk [vmem:[%s1962_s10 + $0x70] sm:$0xff] %vm638_vm1, %v549_v8  ;;  %v1494_v9 = vpop.f32.mrf.mxu1 }
  0xfc   : > { %914 = vst.msk [vmem:[%s1974_s15 + $0x68] sm:$0xff] %vm900_vm2, %v1494_v9  ;;  %v1444_v10 = vpop.f32.mrf.mxu0 }
  0xfd   : > { %656 = vst.msk [vmem:[%s1962_s10 + $0x88] sm:$0xff] %vm638_vm1, %v1444_v10  ;;  %v801_v11 = vpop.f32.mrf.mxu1 }
  0xfe   : > { %913 = vst.msk [vmem:[%s1974_s15 + $0x60] sm:$0xff] %vm900_vm2, %v801_v11  ;;  %v559_v12 = vpop.f32.mrf.mxu0 }
  0xff   : > { %655 = vst.msk [vmem:[%s1962_s10 + $0x80] sm:$0xff] %vm638_vm1, %v559_v12  ;;  %v1497_v13 = vpop.f32.mrf.mxu1 }
 0x100   : > { %916 = vst.msk [vmem:[%s1974_s15 + $0x78] sm:$0xff] %vm900_vm2, %v1497_v13  ;;  %v1447_v14 = vpop.f32.mrf.mxu0 }
 0x101   : > { %658 = vst.msk [vmem:[%s1962_s10 + $0x98] sm:$0xff] %vm638_vm1, %v1447_v14  ;;  %v811_v15 = vpop.f32.mrf.mxu1 }
 0x102   : > { %915 = vst.msk [vmem:[%s1974_s15 + $0x70] sm:$0xff] %vm900_vm2, %v811_v15  ;;  %v569_v16 = vpop.f32.mrf.mxu0 }
 0x103   : > { %657 = vst.msk [vmem:[%s1962_s10 + $0x90] sm:$0xff] %vm638_vm1, %v569_v16  ;;  %v1500_v17 = vpop.f32.mrf.mxu1 }
 0x104   : > { %918 = vst.msk [vmem:[%s1974_s15 + $0x88] sm:$0xff] %vm900_vm2, %v1500_v17  ;;  %v1450_v18 = vpop.f32.mrf.mxu0 }
 0x105   : > { %660 = vst.msk [vmem:[%s1962_s10 + $0xa8] sm:$0xff] %vm638_vm1, %v1450_v18  ;;  %v821_v19 = vpop.f32.mrf.mxu1 }
 0x106   : > { %917 = vst.msk [vmem:[%s1974_s15 + $0x80] sm:$0xff] %vm900_vm2, %v821_v19  ;;  %v579_v20 = vpop.f32.mrf.mxu0 }
 0x107   : > { %659 = vst.msk [vmem:[%s1962_s10 + $0xa0] sm:$0xff] %vm638_vm1, %v579_v20  ;;  %v1503_v21 = vpop.f32.mrf.mxu1 }
 0x108   : > { %920 = vst.msk [vmem:[%s1974_s15 + $0x98] sm:$0xff] %vm900_vm2, %v1503_v21  ;;  %v1453_v22 = vpop.f32.mrf.mxu0 }
 0x109   : > { %662 = vst.msk [vmem:[%s1962_s10 + $0xb8] sm:$0xff] %vm638_vm1, %v1453_v22  ;;  %v831_v23 = vpop.f32.mrf.mxu1 }
 0x10a   : > { %919 = vst.msk [vmem:[%s1974_s15 + $0x90] sm:$0xff] %vm900_vm2, %v831_v23  ;;  %v589_v24 = vpop.f32.mrf.mxu0 }
 0x10b   : > { %661 = vst.msk [vmem:[%s1962_s10 + $0xb0] sm:$0xff] %vm638_vm1, %v589_v24  ;;  %v1506_v25 = vpop.f32.mrf.mxu1 }
 0x10c   : > { %922 = vst.msk [vmem:[%s1974_s15 + $0xa8] sm:$0xff] %vm900_vm2, %v1506_v25  ;;  %v1456_v26 = vpop.f32.mrf.mxu0 }
 0x10d   : > { %664 = vst.msk [vmem:[%s1962_s10 + $0xc8] sm:$0xff] %vm638_vm1, %v1456_v26  ;;  %v841_v27 = vpop.f32.mrf.mxu1 }
 0x10e   : > { %921 = vst.msk [vmem:[%s1974_s15 + $0xa0] sm:$0xff] %vm900_vm2, %v841_v27  ;;  %v599_v28 = vpop.f32.mrf.mxu0 }
 0x10f   : > { %663 = vst.msk [vmem:[%s1962_s10 + $0xc0] sm:$0xff] %vm638_vm1, %v599_v28  ;;  %v1509_v29 = vpop.f32.mrf.mxu1 }
 0x110   : > { %924 = vst.msk [vmem:[%s1974_s15 + $0xb8] sm:$0xff] %vm900_vm2, %v1509_v29  ;;  %v1459_v30 = vpop.f32.mrf.mxu0 }
 0x111   : > { %666 = vst.msk [vmem:[%s1962_s10 + $0xd8] sm:$0xff] %vm638_vm1, %v1459_v30  ;;  %v851_v31 = vpop.f32.mrf.mxu1 }
 0x112   : > { %923 = vst.msk [vmem:[%s1974_s15 + $0xb0] sm:$0xff] %vm900_vm2, %v851_v31  ;;  %v609_v32 = vpop.f32.mrf.mxu0 }
 0x113   : > { %665 = vst.msk [vmem:[%s1962_s10 + $0xd0] sm:$0xff] %vm638_vm1, %v609_v32  ;;  %v1512_v33 = vpop.f32.mrf.mxu1 }
 0x114   : > { %926 = vst.msk [vmem:[%s1974_s15 + $0xc8] sm:$0xff] %vm900_vm2, %v1512_v33  ;;  %v1462_v34 = vpop.f32.mrf.mxu0 }
 0x115   : > { %668 = vst.msk [vmem:[%s1962_s10 + $0xe8] sm:$0xff] %vm638_vm1, %v1462_v34  ;;  %v861_v35 = vpop.f32.mrf.mxu1 }
 0x116   : > { %925 = vst.msk [vmem:[%s1974_s15 + $0xc0] sm:$0xff] %vm900_vm2, %v861_v35  ;;  %v619_v36 = vpop.f32.mrf.mxu0 }
 0x117   : > { %667 = vst.msk [vmem:[%s1962_s10 + $0xe0] sm:$0xff] %vm638_vm1, %v619_v36  ;;  %v1515_v37 = vpop.f32.mrf.mxu1 }
 0x118   : > { %928 = vst.msk [vmem:[%s1974_s15 + $0xd8] sm:$0xff] %vm900_vm2, %v1515_v37  ;;  %v1465_v38 = vpop.f32.mrf.mxu0 }
 0x119   : > { %670 = vst.msk [vmem:[%s1962_s10 + $0xf8] sm:$0xff] %vm638_vm1, %v1465_v38  ;;  %v871_v39 = vpop.f32.mrf.mxu1 }
 0x11a   : > { %927 = vst.msk [vmem:[%s1974_s15 + $0xd0] sm:$0xff] %vm900_vm2, %v871_v39  ;;  %v629_v40 = vpop.f32.mrf.mxu0 }
 0x11b   : > { %669 = vst.msk [vmem:[%s1962_s10 + $0xf0] sm:$0xff] %vm638_vm1, %v629_v40  ;;  %v1518_v41 = vpop.f32.mrf.mxu1  ;;  %s1566_s10 = sshll.u32 %s1624_s9, 4  ;;  %s1567_s10 = int_to_ptr.vmem [resolvable:$false] %s1566_s10 }
 0x11c   : > { %930 = vst.msk [vmem:[%s1974_s15 + $0xe8] sm:$0xff] %vm900_vm2, %v1518_v41  ;;  %s1568_s25 = scalar_lea.vmem %s1567_s10, 256  ;;  %p1569_p0 = scmp.lt.s32.totalorder %s1078_s18, %s1567_s10 }
 0x11d   : > { %v881_v42 = vpop.f32.mrf.mxu1  ;;  %p1570_p1 = scmp.lt.s32.totalorder %s1568_s25, %s1562_s29 }
 0x11e   : > { %929 = vst.msk [vmem:[%s1974_s15 + $0xe0] sm:$0xff] %vm900_vm2, %v881_v42 }
 0x11f   : > { %v1521_v43 = vpop.f32.mrf.mxu1  ;;  %p1571_p2 = por %p1570_p1, %p1569_p0 }
 0x120   : > { %932 = vst.msk [vmem:[%s1974_s15 + $0xf8] sm:$0xff] %vm900_vm2, %v1521_v43 }
 0x121   : > { %v891_v44 = vpop.f32.mrf.mxu1  ;;  %p1572_p3 = pnand %p1571_p2, %p1565_p13 }
 0x122   : > { %931 = vst.msk [vmem:[%s1974_s15 + $0xf0] sm:$0xff] %vm900_vm2, %v891_v44 }
 0x152   : > { %v1038_v45 = vpop.f32.mrf.mxu0 }
 0x154   : > { %v1040_v46 = vpop.f32.mrf.mxu0 }
 0x155   : > { %v1045_v47 = vcombine.low %v1038_v45, %v1040_v46 }
 0x157   : > { %1047 = vst [vmem:[%s253_s11] sm:$0xff] %v1045_v47 }
 0x158   : > { %1575 = shalt.err (!%p1572_p3)
}
 0x159   : > { %s1576_s13 = scalar_lea.hbm %s1075_s26, 128  ;;  %s1580_s12 = scalar_lea.hbm %s2137_s5, 256 }
 0x15a   : > { %p1577_p4 = scmp.ne.s32.totalorder %s1075_s26, %s1576_s13  ;;  %p1581_p9 = scmp.lt.s32.totalorder %s1075_s26, %s2137_s5 }
 0x15b   : > { %p1582_p10 = scmp.lt.s32.totalorder %s1580_s12, %s1576_s13 }
 0x15c   : > { %p1578_p7 = pnand %p1577_p4, %p1698_p5 }
 0x15d   : > { %p1583_p11 = por %p1582_p10, %p1581_p9 }
 0x15e   : > { %p1579_p8 = pneg %p1578_p7 }
 0x160   : > { %p1584_p12 = pnand %p1583_p11, %p1579_p8 }
 0x162   : > { %1587 = shalt.err (!%p1584_p12)
}
 0x163   : > { %1522 = dma.vmem_to_hbm [thread:$0]  (%p1698_p5), %s1078_s18, 128, %s1075_s26, %s1054_s28  }
 0x164 PF: > { %p1528_p13 = scmp.ge.s32.totalorder %s1622_s24, 2  ;;  %s1101_s11 = sand.u32 1, %s1610_s21  }
 0x165   : > { %s1102_s19 = scalar_lea.sflag [#allocation3], %s1101_s11 }
 0x166   : > { %p1525_p0 = pnand %p1528_p13, %p1702_p6 }
 0x168   : > { %p1526_p1 = pneg %p1525_p0 }
 0x16a   : > { %1605 = dma.done.wait (%p1526_p1), %s1102_s19, 128  }
 0x16b   : > { %1607 = vsyncadd (%p1526_p1), %s1102_s19, 4294967168  ;;  %p17_p2 = scmp.ge.s32.totalorder %s1685_s27, 4   ;;  %s2141_s21 = smov %s1614_s22 }
 0x16c   : > { %s2142_s22 = smov %s1618_s23  ;;  %s2143_s23 = smov %s1696_s30 }
 0x16d   : > { %s2144_s24 = smov %s1685_s27  ;;  %19 = sbr.rel (!%p17_p2) target bundleno = 3 (0x3), region = 95 }
 0x172   :  { %1115 = vsyncpa [#allocation3], 1 }
 0x173   :  { %1117 = vsyncpa [#allocation3 + $0x1], 1 }

</bundles_post_ra>
